<compile_context>
chip_gen: v5e
topology: v5e:2x2
jax: 0.10.0
libtpu: 0.0.40
codegen_flags: <defaults>
</compile_context>

<pallas_src>
import math
import random

import numpy as np

import jax
import jax.numpy as jnp
from jax import lax
from jax.experimental import pallas as pl
from jax.experimental.pallas import tpu as pltpu

# ------------------------- config (cfg.*) -----------------------------------
NUM_CLASSES = 6          # "6_to_6_label"
K_PAD = 128              # lane-dense padding of the class axis
LR = 1e-3                # cfg.ADAPTER.LR
WD = 0.0                 # cfg.OPTIM.WD
EMA_DECAY = 0.999        # cfg.ADAPTER.EMA_DECAY
NU = 1.0 - EMA_DECAY
MEMORY_SIZE = 16         # cfg.ADAPTER.MEMORY_SIZE
ADAPT_BATCH = 2          # cfg.ADAPTER.BATCH_SIZE
ADAM_B1, ADAM_B2, ADAM_EPS = 0.9, 0.999, 1e-8

# rows 0..ADAPT_BATCH-1 of the host scalar slab hold timeliness weights,
# rows 6/7 hold the Adam bias corrections.
assert ADAPT_BATCH <= 6

_ARBITRARY_1D = pltpu.CompilerParams(dimension_semantics=("arbitrary",))


# ======================= kernel 1: teacher fwd + bank insert =================
def teacher_insert_kernel(slots_ref,                       # SMEM prefetch (N,)
                          x_ref, W_ref, Bb_ref,             # inputs
                          memx_in, memy_in, memu_in,        # aliased banks (unread)
                          logits_ref, memx_out, memy_out, memu_out):
    del memx_in, memy_in, memu_in, slots_ref  # slots only drive the index_maps

    # synthetic backbone: global average pool over spatial, then teacher head
    feat = jnp.mean(x_ref[...], axis=-1)                              # (1, C)
    z = jnp.dot(feat, W_ref[3],
                preferred_element_type=jnp.float32) + Bb_ref[3:4, :]  # (1, K_PAD)

    # exact sigmoid on the pseudo-label threshold path (bit fidelity)
    probs = 1.0 / (1.0 + jnp.exp(-z))
    mask = (lax.broadcasted_iota(jnp.int32, z.shape, 1)
            < NUM_CLASSES).astype(jnp.float32)                        # real classes
    pseudo = (probs > 0.5).astype(jnp.float32) * mask
    unc = (1.0 - jnp.abs(probs - 0.5) * 2.0) * mask
    mean_unc = jnp.sum(unc, axis=1, keepdims=True) * (1.0 / NUM_CLASSES)

    logits_ref[...] = z.reshape(logits_ref.shape)          # pre-adaptation logits
    # on-device FIFO insertion: this sample's row + pseudo label + uncertainty
    # land directly in their (scalar-prefetched) bank slot.
    memx_out[...] = x_ref[...]
    memy_out[...] = pseudo.reshape(memy_out.shape)
    memu_out[...] = jnp.broadcast_to(mean_unc, memu_out.shape)


def teacher_insert(slots, x_ncap, W, Bb, mem_x, mem_y, mem_unc):
    N, C, HW = x_ncap.shape

    grid_spec = pltpu.PrefetchScalarGridSpec(
        num_scalar_prefetch=1,                 # slots -> SMEM
        grid=(N,),                             # one sample per step (scales to
        in_specs=[                             # big backbones / v7x VMEM too)
            pl.BlockSpec((1, C, HW), lambda i, sl: (i, 0, 0)),         # x row
            pl.BlockSpec((4, C, K_PAD), lambda i, sl: (0, 0, 0)),      # W slab
            pl.BlockSpec((8, K_PAD), lambda i, sl: (0, 0)),            # Bb slab
            pl.BlockSpec((1, C, HW), lambda i, sl: (sl[i], 0, 0)),     # mem_x (alias)
            pl.BlockSpec((1, 1, K_PAD), lambda i, sl: (sl[i], 0, 0)),  # mem_y (alias)
            pl.BlockSpec((1, 1, K_PAD), lambda i, sl: (sl[i], 0, 0)),  # mem_unc (alias)
        ],
        out_specs=(
            pl.BlockSpec((1, 1, K_PAD), lambda i, sl: (i, 0, 0)),      # logits
            pl.BlockSpec((1, C, HW), lambda i, sl: (sl[i], 0, 0)),     # mem_x
            pl.BlockSpec((1, 1, K_PAD), lambda i, sl: (sl[i], 0, 0)),  # mem_y
            pl.BlockSpec((1, 1, K_PAD), lambda i, sl: (sl[i], 0, 0)),  # mem_unc
        ),
    )
    out_shape = (
        jax.ShapeDtypeStruct((N, 1, K_PAD), jnp.float32),
        jax.ShapeDtypeStruct(mem_x.shape, jnp.float32),
        jax.ShapeDtypeStruct(mem_y.shape, jnp.float32),
        jax.ShapeDtypeStruct(mem_unc.shape, jnp.float32),
    )
    return pl.pallas_call(
        teacher_insert_kernel,
        grid_spec=grid_spec,
        out_shape=out_shape,
        # flattened operand indices incl. the scalar-prefetch arg:
        # slots=0, x=1, W=2, Bb=3, mem_x=4, mem_y=5, mem_unc=6
        input_output_aliases={4: 1, 5: 2, 6: 3},
        compiler_params=_ARBITRARY_1D,
    )(slots, x_ncap, W, Bb, mem_x, mem_y, mem_unc)


# === kernel 2: fused gather + student fwd + grads + Adam + EMA + final fwd ===
def adapt_kernel(idx_ref,                                  # SMEM prefetch (B,)
                 scal_ref, W_ref, Bb_ref, x_ref,           # VMEM inputs
                 memx_hbm, memy_hbm,                       # pl.ANY (HBM) banks
                 W_out, Bb_out, out_ref,                   # outputs
                 xbuf, ybuf, sem):                         # scratch
    # ---- manual DMA gather of the sampled memory-bank rows (HBM -> VMEM) ----
    for b in range(ADAPT_BATCH):                           # static, B = 2
        pltpu.make_async_copy(memx_hbm.at[idx_ref[b]], xbuf.at[b], sem.at[0, b]).start()
        pltpu.make_async_copy(memy_hbm.at[idx_ref[b]], ybuf.at[b], sem.at[1, b]).start()
    for b in range(ADAPT_BATCH):
        pltpu.make_async_copy(memx_hbm.at[idx_ref[b]], xbuf.at[b], sem.at[0, b]).wait()
        pltpu.make_async_copy(memy_hbm.at[idx_ref[b]], ybuf.at[b], sem.at[1, b]).wait()

    # ---- student forward on the whole adaptation batch ----------------------
    feat = jnp.mean(xbuf[...], axis=-1)                               # (B, C)
    wT = W_ref[0]                                                     # (C, K_PAD)
    b_s = Bb_ref[0:1, :]                                              # (1, K_PAD)
    z = jnp.dot(feat, wT, preferred_element_type=jnp.float32) + b_s   # (B, K_PAD)

    probs = pl.reciprocal(1.0 + jnp.exp(-z), approx=True)             # sigmoid (EUP)
    y = jnp.concatenate([ybuf[b] for b in range(ADAPT_BATCH)], axis=0)  # (B, K_PAD)
    mask = (lax.broadcasted_iota(jnp.int32, z.shape, 1)
            < NUM_CLASSES).astype(jnp.float32)

    # d(final_loss)/dz for BCEWithLogitsLoss(reduction='none').mean(dim=1),
    # timeliness-reweighted (host-precomputed w_b = exp(-age/100)) and
    # batch-averaged:  w_b / (B*K) * (sigmoid(z) - y)
    w_t = scal_ref[0:ADAPT_BATCH, :]                                  # (B, K_PAD)
    g = (probs - y) * mask * w_t * (1.0 / (ADAPT_BATCH * NUM_CLASSES))

    # batched MXU outer product: gW = feat^T @ g  (contract over the batch)
    gW = lax.dot_general(feat, g, (((0,), (0,)), ((), ())),
                         preferred_element_type=jnp.float32)          # (C, K_PAD)
    gb = jnp.sum(g, axis=0, keepdims=True)                            # (1, K_PAD)

    # ---- Adam step (bias corrections precomputed on host) + EMA teacher -----
    lr_c = scal_ref[6:7, :]     # LR / (1 - beta1**t)
    isb2 = scal_ref[7:8, :]     # 1 / sqrt(1 - beta2**t)

    def adam_ema(grad, p, m, v, tp):
        grad = grad + WD * p
        m_n = ADAM_B1 * m + (1.0 - ADAM_B1) * grad
        v_n = ADAM_B2 * v + (1.0 - ADAM_B2) * grad * grad
        p_n = p - lr_c * m_n / (jnp.sqrt(v_n) * isb2 + ADAM_EPS)
        # update_ema_variables: teacher = (1 - nu) * teacher + nu * student
        t_n = (1.0 - NU) * tp + NU * p_n
        return p_n, m_n, v_n, t_n

    pW, mW, vW, tW = adam_ema(gW, wT, W_ref[1], W_ref[2], W_ref[3])
    W_out[0] = pW
    W_out[1] = mW
    W_out[2] = vW
    W_out[3] = tW

    pb, mb, vb, tb = adam_ema(gb, b_s, Bb_ref[1:2, :], Bb_ref[2:3, :], Bb_ref[3:4, :])
    Bb_out[...] = jnp.concatenate([pb, mb, vb, tb, Bb_ref[4:8, :]], axis=0)

    # ---- final_output = teacher(x) with the freshly EMA-updated teacher -----
    featx = jnp.mean(x_ref[...], axis=-1)                             # (N, C)
    out_ref[...] = jnp.dot(featx, tW, preferred_element_type=jnp.float32) + tb


def adapt_and_update(idx, scal, W, Bb, x_ncap, mem_x, mem_y):
    N, C, HW = x_ncap.shape
    M = mem_x.shape[0]

    grid_spec = pltpu.PrefetchScalarGridSpec(
        num_scalar_prefetch=1,                       # idx -> SMEM
        grid=(1,),                                   # single fused grid step
        in_specs=[
            pl.BlockSpec((8, K_PAD), lambda i, idx: (0, 0)),          # host scalars
            pl.BlockSpec((4, C, K_PAD), lambda i, idx: (0, 0, 0)),    # W slab
            pl.BlockSpec((8, K_PAD), lambda i, idx: (0, 0)),          # Bb slab
            pl.BlockSpec((N, C, HW), lambda i, idx: (0, 0, 0)),       # x (final fwd)
            pl.BlockSpec(memory_space=pl.ANY),                        # mem_x (HBM)
            pl.BlockSpec(memory_space=pl.ANY),                        # mem_y (HBM)
        ],
        out_specs=(
            pl.BlockSpec((4, C, K_PAD), lambda i, idx: (0, 0, 0)),
            pl.BlockSpec((8, K_PAD), lambda i, idx: (0, 0)),
            pl.BlockSpec((N, K_PAD), lambda i, idx: (0, 0)),
        ),
        scratch_shapes=[
            pltpu.VMEM((ADAPT_BATCH, C, HW), jnp.float32),            # gathered x rows
            pltpu.VMEM((ADAPT_BATCH, 1, K_PAD), jnp.float32),         # gathered labels
            pltpu.SemaphoreType.DMA((2, ADAPT_BATCH)),
        ],
    )
    out_shape = (
        jax.ShapeDtypeStruct((4, C, K_PAD), jnp.float32),   # W slab (in place)
        jax.ShapeDtypeStruct((8, K_PAD), jnp.float32),      # Bb slab (in place)
        jax.ShapeDtypeStruct((N, K_PAD), jnp.float32),      # post-adaptation logits
    )
    return pl.pallas_call(
        adapt_kernel,
        grid_spec=grid_spec,
        out_shape=out_shape,
        # flattened operand indices incl. the scalar-prefetch arg:
        # idx=0, scal=1, W=2, Bb=3, x=4, mem_x=5, mem_y=6
        input_output_aliases={2: 0, 3: 1},
        compiler_params=_ARBITRARY_1D,
    )(idx, scal, W, Bb, x_ncap, mem_x, mem_y)


# ------------------------- adapter (host-side glue) --------------------------
class RoTTAMultiLabelPallas:
    def __init__(self, key, feat_c, num_classes):
        kw, kb = jax.random.split(key)
        bound = 1.0 / (feat_c ** 0.5)
        # nn.Linear(feat_c, num_classes) default init; stored transposed and
        # padded to K_PAD lanes (padded columns stay exactly zero forever since
        # their gradients are masked).
        w = jax.random.uniform(kw, (num_classes, feat_c), jnp.float32, -bound, bound)
        b = jax.random.uniform(kb, (num_classes,), jnp.float32, -bound, bound)
        wT_pad = jnp.zeros((feat_c, K_PAD), jnp.float32).at[:, :num_classes].set(w.T)
        b_pad = jnp.zeros((K_PAD,), jnp.float32).at[:num_classes].set(b)

        # packed parameter slabs:
        #   W  rows: 0=student wT, 1=adam m, 2=adam v, 3=teacher wT (build_ema copy)
        #   Bb rows: 0=student b,  1=adam m, 2=adam v, 3=teacher b,  4..7 unused
        zero_w = jnp.zeros_like(wT_pad)
        self.W = jnp.stack([wT_pad, zero_w, zero_w, wT_pad], axis=0)
        Bb = jnp.zeros((8, K_PAD), jnp.float32)
        self.Bb = Bb.at[0].set(b_pad).at[3].set(b_pad)

        self.adapt_steps = 0
        # TODO(synk): CSTUMultiLabel (class-balanced timeliness/uncertainty
        # memory) is not defined in the reference; use a FIFO ring buffer held
        # in preallocated device arrays (written / gathered in-kernel).  The
        # per-sample mean uncertainty is stored in mem_unc for a future CSTU
        # policy but the FIFO itself does not read it.
        self.mem_x = None                                              # (M, C, HW), lazy
        self.mem_y = jnp.zeros((MEMORY_SIZE, 1, K_PAD), jnp.float32)
        self.mem_unc = jnp.zeros((MEMORY_SIZE, 1, K_PAD), jnp.float32)
        self.mem_age = [0] * MEMORY_SIZE
        self.mem_len = 0
        self.mem_ptr = 0

    def forward(self, x):
        N, C, H, W_ = x.shape
        assert N <= MEMORY_SIZE
        x_ncap = x.reshape(N, C, H * W_)
        if self.mem_x is None:
            self.mem_x = jnp.zeros((MEMORY_SIZE, C, H * W_), jnp.float32)

        # ---- FIFO slot assignment + age bookkeeping (host scalars only) -----
        slots = []
        for _ in range(N):
            for s in range(self.mem_len):
                self.mem_age[s] += 1
            slot = self.mem_ptr
            slots.append(slot)
            self.mem_age[slot] = 0
            self.mem_ptr = (slot + 1) % MEMORY_SIZE
            self.mem_len = min(self.mem_len + 1, MEMORY_SIZE)
        slots_arr = jnp.asarray(slots, jnp.int32)

        # ---- get_teacher_output + on-device memory-bank insertion -----------
        (logits, self.mem_x, self.mem_y, self.mem_unc) = teacher_insert(
            slots_arr, x_ncap, self.W, self.Bb,
            self.mem_x, self.mem_y, self.mem_unc)

        # ---- adaptation step (gather + student fwd + Adam + EMA + final fwd)
        if self.mem_len >= ADAPT_BATCH:
            indices = random.sample(range(self.mem_len), ADAPT_BATCH)
            self.adapt_steps += 1
            t = self.adapt_steps
            # host-precomputed scalars (timeliness weights + Adam bias corr.)
            scal = np.zeros((8, K_PAD), np.float32)
            for b, mi in enumerate(indices):
                scal[b, :] = math.exp(-self.mem_age[mi] / 100.0)   # timeliness_reweighting
            scal[6, :] = LR / (1.0 - ADAM_B1 ** t)
            scal[7, :] = 1.0 / math.sqrt(1.0 - ADAM_B2 ** t)
            idx = jnp.asarray(indices, jnp.int32)

            self.W, self.Bb, final_logits = adapt_and_update(
                idx, jnp.asarray(scal), self.W, self.Bb, x_ncap,
                self.mem_x, self.mem_y)
            # reference: final_output = teacher(x) AFTER update_ema_variables
            return final_logits[:, :NUM_CLASSES]

        # no adaptation -> teacher unchanged -> pre-adaptation logits are final
        return logits[:, 0, :NUM_CLASSES]


# ------------------------- main ----------------------------------------------
if __name__ == "__main__":
    random.seed(0)
    key = jax.random.PRNGKey(0)
    kx, kp = jax.random.split(key)

    N, C, H, W = 2, 32, 16, 16
    x = jax.random.normal(kx, (N, C, H, W), jnp.float32)

    adapter = RoTTAMultiLabelPallas(kp, feat_c=C, num_classes=NUM_CLASSES)
    out = adapter.forward(x)
    out = jax.block_until_ready(out)
    assert out.shape == (N, NUM_CLASSES)
    print("KERNEL_OK")
</pallas_src>

<mosaic_0001>
module attributes {stable_mosaic.version = 11 : i64} {
  func.func @teacher_insert_kernel(%arg0: i32, %arg1: memref<2xi32, #tpu.memory_space<smem>>, %arg2: memref<1x32x256xf32, #tpu.memory_space<vmem>>, %arg3: memref<4x32x128xf32, #tpu.memory_space<vmem>>, %arg4: memref<8x128xf32, #tpu.memory_space<vmem>>, %arg5: memref<1x32x256xf32, #tpu.memory_space<vmem>>, %arg6: memref<1x1x128xf32, #tpu.memory_space<vmem>>, %arg7: memref<1x1x128xf32, #tpu.memory_space<vmem>>, %arg8: memref<1x1x128xf32, #tpu.memory_space<vmem>>, %arg9: memref<1x32x256xf32, #tpu.memory_space<vmem>>, %arg10: memref<1x1x128xf32, #tpu.memory_space<vmem>>, %arg11: memref<1x1x128xf32, #tpu.memory_space<vmem>>) attributes {dimension_semantics = [#tpu.dimension_semantics<arbitrary>], iteration_bounds = array<i64: 2>, scalar_prefetch = 1 : i64, scratch_operands = 0 : i64, tpu.core_type = #tpu.core_type<tc>, window_params = [{transform_indices = @transform_0, window_bounds = array<i64: 1, 32, 256>}, {pipeline_mode = #tpu.pipeline_mode<synchronous>, transform_indices = @transform_1, window_bounds = array<i64: 4, 32, 128>}, {pipeline_mode = #tpu.pipeline_mode<synchronous>, transform_indices = @transform_2, window_bounds = array<i64: 8, 128>}, {transform_indices = @transform_3, window_bounds = array<i64: 1, 32, 256>}, {transform_indices = @transform_4, window_bounds = array<i64: 1, 1, 128>}, {transform_indices = @transform_5, window_bounds = array<i64: 1, 1, 128>}, {transform_indices = @transform_6, window_bounds = array<i64: 1, 1, 128>}, {transform_indices = @transform_7, window_bounds = array<i64: 1, 32, 256>}, {transform_indices = @transform_8, window_bounds = array<i64: 1, 1, 128>}, {transform_indices = @transform_9, window_bounds = array<i64: 1, 1, 128>}]} {
    %c0 = arith.constant 0 : index
    %c0_0 = arith.constant 0 : index
    %c0_1 = arith.constant 0 : index
    %0 = vector.load %arg2[%c0, %c0_0, %c0_1] : memref<1x32x256xf32, #tpu.memory_space<vmem>>, vector<1x32x256xf32>
    %cst = arith.constant dense<0.000000e+00> : vector<1x32xf32>
    %1 = vector.multi_reduction <add>, %0, %cst [2] : vector<1x32x256xf32> to vector<1x32xf32>
    %cst_2 = arith.constant 2.560000e+02 : f32
    %2 = vector.broadcast %cst_2 : f32 to vector<1x32xf32>
    %3 = arith.divf %1, %2 : vector<1x32xf32>
    %c3 = arith.constant 3 : index
    %c0_3 = arith.constant 0 : index
    %c0_4 = arith.constant 0 : index
    %4 = vector.load %arg3[%c3, %c0_3, %c0_4] : memref<4x32x128xf32, #tpu.memory_space<vmem>>, vector<1x32x128xf32>
    %5 = vector.shape_cast %4 : vector<1x32x128xf32> to vector<32x128xf32>
    %cst_5 = arith.constant dense<0.000000e+00> : vector<1x128xf32>
    %6 = tpu.matmul %3, %5, %cst_5 {dimension_numbers = #tpu.dot_dimension_numbers<[1], [0], [0], [1], [0, 0, 1, 1], [], []>} : vector<1x32xf32>, vector<32x128xf32>, vector<1x128xf32> -> vector<1x128xf32>
    %c3_6 = arith.constant 3 : index
    %c0_7 = arith.constant 0 : index
    %7 = vector.load %arg4[%c3_6, %c0_7] : memref<8x128xf32, #tpu.memory_space<vmem>>, vector<1x128xf32>
    %8 = arith.addf %6, %7 : vector<1x128xf32>
    %cst_8 = arith.constant 0.000000e+00 : f32
    %9 = vector.broadcast %cst_8 : f32 to vector<1x128xf32>
    %10 = arith.subf %9, %8 : vector<1x128xf32>
    %11 = math.exp %10 : vector<1x128xf32>
    %cst_9 = arith.constant 1.000000e+00 : f32
    %12 = vector.broadcast %cst_9 : f32 to vector<1x128xf32>
    %13 = arith.addf %12, %11 : vector<1x128xf32>
    %cst_10 = arith.constant 1.000000e+00 : f32
    %14 = vector.broadcast %cst_10 : f32 to vector<1x128xf32>
    %15 = arith.divf %14, %13 : vector<1x128xf32>
    %16 = tpu.iota {dimensions = array<i32: 1>} : vector<1x128xi32>
    %c6_i32 = arith.constant 6 : i32
    %17 = vector.broadcast %c6_i32 : i32 to vector<1x128xi32>
    %18 = arith.cmpi slt, %16, %17 : vector<1x128xi32>
    %19 = arith.extui %18 : vector<1x128xi1> to vector<1x128xi32>
    %20 = arith.sitofp %19 : vector<1x128xi32> to vector<1x128xf32>
    %cst_11 = arith.constant 5.000000e-01 : f32
    %21 = vector.broadcast %cst_11 : f32 to vector<1x128xf32>
    %22 = arith.cmpf ogt, %15, %21 : vector<1x128xf32>
    %23 = arith.extui %22 : vector<1x128xi1> to vector<1x128xi32>
    %24 = arith.sitofp %23 : vector<1x128xi32> to vector<1x128xf32>
    %25 = arith.mulf %24, %20 : vector<1x128xf32>
    %cst_12 = arith.constant 5.000000e-01 : f32
    %26 = vector.broadcast %cst_12 : f32 to vector<1x128xf32>
    %27 = arith.subf %15, %26 : vector<1x128xf32>
    %28 = math.absf %27 : vector<1x128xf32>
    %cst_13 = arith.constant 2.000000e+00 : f32
    %29 = vector.broadcast %cst_13 : f32 to vector<1x128xf32>
    %30 = arith.mulf %28, %29 : vector<1x128xf32>
    %cst_14 = arith.constant 1.000000e+00 : f32
    %31 = vector.broadcast %cst_14 : f32 to vector<1x128xf32>
    %32 = arith.subf %31, %30 : vector<1x128xf32>
    %33 = arith.mulf %32, %20 : vector<1x128xf32>
    %cst_15 = arith.constant dense<0.000000e+00> : vector<1xf32>
    %34 = vector.multi_reduction <add>, %33, %cst_15 [1] : vector<1x128xf32> to vector<1xf32>
    %35 = vector.shape_cast %34 : vector<1xf32> to vector<1x1xf32>
    %cst_16 = arith.constant 0.166666672 : f32
    %36 = vector.broadcast %cst_16 : f32 to vector<1x1xf32>
    %37 = arith.mulf %35, %36 : vector<1x1xf32>
    %38 = vector.shape_cast %8 : vector<1x128xf32> to vector<1x1x128xf32>
    %c0_17 = arith.constant 0 : index
    %c0_18 = arith.constant 0 : index
    %c0_19 = arith.constant 0 : index
    %39 = vector.load %arg8[%c0_17, %c0_18, %c0_19] : memref<1x1x128xf32, #tpu.memory_space<vmem>>, vector<1x1x128xf32>
    tpu.vector_store %arg8[%c0_17, %c0_18, %c0_19], %38 {strides = array<i32>} : memref<1x1x128xf32, #tpu.memory_space<vmem>>, vector<1x1x128xf32>,
    %c0_20 = arith.constant 0 : index
    %c0_21 = arith.constant 0 : index
    %c0_22 = arith.constant 0 : index
    %40 = vector.load %arg2[%c0_20, %c0_21, %c0_22] : memref<1x32x256xf32, #tpu.memory_space<vmem>>, vector<1x32x256xf32>
    %c0_23 = arith.constant 0 : index
    %c0_24 = arith.constant 0 : index
    %c0_25 = arith.constant 0 : index
    %41 = vector.load %arg9[%c0_23, %c0_24, %c0_25] : memref<1x32x256xf32, #tpu.memory_space<vmem>>, vector<1x32x256xf32>
    tpu.vector_store %arg9[%c0_23, %c0_24, %c0_25], %40 {strides = array<i32>} : memref<1x32x256xf32, #tpu.memory_space<vmem>>, vector<1x32x256xf32>,
    %42 = vector.shape_cast %25 : vector<1x128xf32> to vector<1x1x128xf32>
    %c0_26 = arith.constant 0 : index
    %c0_27 = arith.constant 0 : index
    %c0_28 = arith.constant 0 : index
    %43 = vector.load %arg10[%c0_26, %c0_27, %c0_28] : memref<1x1x128xf32, #tpu.memory_space<vmem>>, vector<1x1x128xf32>
    tpu.vector_store %arg10[%c0_26, %c0_27, %c0_28], %42 {strides = array<i32>} : memref<1x1x128xf32, #tpu.memory_space<vmem>>, vector<1x1x128xf32>,
    %44 = vector.shape_cast %37 : vector<1x1xf32> to vector<1x1x1xf32>
    %45 = vector.broadcast %44 : vector<1x1x1xf32> to vector<1x1x128xf32>
    %c0_29 = arith.constant 0 : index
    %c0_30 = arith.constant 0 : index
    %c0_31 = arith.constant 0 : index
    %46 = vector.load %arg11[%c0_29, %c0_30, %c0_31] : memref<1x1x128xf32, #tpu.memory_space<vmem>>, vector<1x1x128xf32>
    tpu.vector_store %arg11[%c0_29, %c0_30, %c0_31], %45 {strides = array<i32>} : memref<1x1x128xf32, #tpu.memory_space<vmem>>, vector<1x1x128xf32>,
    return
  }
  func.func @transform_0(%arg0: i32, %arg1: memref<2xi32, #tpu.memory_space<smem>>) -> (i32, i32, i32) {
    %c0_i32 = arith.constant 0 : i32
    %c0_i32_0 = arith.constant 0 : i32
    %c0_i32_1 = arith.constant 0 : i32
    return %arg0, %c0_i32, %c0_i32_0 : i32, i32, i32
  }
  func.func @transform_1(%arg0: i32, %arg1: memref<2xi32, #tpu.memory_space<smem>>) -> (i32, i32, i32) {
    %c0_i32 = arith.constant 0 : i32
    %c0_i32_0 = arith.constant 0 : i32
    %c0_i32_1 = arith.constant 0 : i32
    %c0_i32_2 = arith.constant 0 : i32
    return %c0_i32, %c0_i32_0, %c0_i32_1 : i32, i32, i32
  }
  func.func @transform_2(%arg0: i32, %arg1: memref<2xi32, #tpu.memory_space<smem>>) -> (i32, i32) {
    %c0_i32 = arith.constant 0 : i32
    %c0_i32_0 = arith.constant 0 : i32
    %c0_i32_1 = arith.constant 0 : i32
    return %c0_i32, %c0_i32_0 : i32, i32
  }
  func.func @transform_3(%arg0: i32, %arg1: memref<2xi32, #tpu.memory_space<smem>>) -> (i32, i32, i32) {
    %0 = arith.index_cast %arg0 : i32 to index
    %1 = memref.load %arg1[%0] : memref<2xi32, #tpu.memory_space<smem>>
    %c0_i32 = arith.constant 0 : i32
    %c0_i32_0 = arith.constant 0 : i32
    %c0_i32_1 = arith.constant 0 : i32
    return %1, %c0_i32, %c0_i32_0 : i32, i32, i32
  }
  func.func @transform_4(%arg0: i32, %arg1: memref<2xi32, #tpu.memory_space<smem>>) -> (i32, i32, i32) {
    %0 = arith.index_cast %arg0 : i32 to index
    %1 = memref.load %arg1[%0] : memref<2xi32, #tpu.memory_space<smem>>
    %c0_i32 = arith.constant 0 : i32
    %c0_i32_0 = arith.constant 0 : i32
    %c0_i32_1 = arith.constant 0 : i32
    return %1, %c0_i32, %c0_i32_0 : i32, i32, i32
  }
  func.func @transform_5(%arg0: i32, %arg1: memref<2xi32, #tpu.memory_space<smem>>) -> (i32, i32, i32) {
    %0 = arith.index_cast %arg0 : i32 to index
    %1 = memref.load %arg1[%0] : memref<2xi32, #tpu.memory_space<smem>>
    %c0_i32 = arith.constant 0 : i32
    %c0_i32_0 = arith.constant 0 : i32
    %c0_i32_1 = arith.constant 0 : i32
    return %1, %c0_i32, %c0_i32_0 : i32, i32, i32
  }
  func.func @transform_6(%arg0: i32, %arg1: memref<2xi32, #tpu.memory_space<smem>>) -> (i32, i32, i32) {
    %c0_i32 = arith.constant 0 : i32
    %c0_i32_0 = arith.constant 0 : i32
    %c0_i32_1 = arith.constant 0 : i32
    return %arg0, %c0_i32, %c0_i32_0 : i32, i32, i32
  }
  func.func @transform_7(%arg0: i32, %arg1: memref<2xi32, #tpu.memory_space<smem>>) -> (i32, i32, i32) {
    %0 = arith.index_cast %arg0 : i32 to index
    %1 = memref.load %arg1[%0] : memref<2xi32, #tpu.memory_space<smem>>
    %c0_i32 = arith.constant 0 : i32
    %c0_i32_0 = arith.constant 0 : i32
    %c0_i32_1 = arith.constant 0 : i32
    return %1, %c0_i32, %c0_i32_0 : i32, i32, i32
  }
  func.func @transform_8(%arg0: i32, %arg1: memref<2xi32, #tpu.memory_space<smem>>) -> (i32, i32, i32) {
    %0 = arith.index_cast %arg0 : i32 to index
    %1 = memref.load %arg1[%0] : memref<2xi32, #tpu.memory_space<smem>>
    %c0_i32 = arith.constant 0 : i32
    %c0_i32_0 = arith.constant 0 : i32
    %c0_i32_1 = arith.constant 0 : i32
    return %1, %c0_i32, %c0_i32_0 : i32, i32, i32
  }
  func.func @transform_9(%arg0: i32, %arg1: memref<2xi32, #tpu.memory_space<smem>>) -> (i32, i32, i32) {
    %0 = arith.index_cast %arg0 : i32 to index
    %1 = memref.load %arg1[%0] : memref<2xi32, #tpu.memory_space<smem>>
    %c0_i32 = arith.constant 0 : i32
    %c0_i32_0 = arith.constant 0 : i32
    %c0_i32_1 = arith.constant 0 : i32
    return %1, %c0_i32, %c0_i32_0 : i32, i32, i32
  }
}

</mosaic_0001>

<bundles_post_ra>
// kernel: tpu_custom_call.1
= control target key start
LH: loop header
LB: loop body
LE: loop exit
PB: predicated region body
PF: predicated region fallthrough
CT: control target
= control target key end

     0   :  { %s1592_s16 = smov [#allocation3]   ;;  %s2314_s0 = inlined_call_operand.vmem [shape: s32[2], index: 0, kind: input, shape index: {}]   ;;  %s2315_s1 = inlined_call_operand.vmem [shape: f32[2,32,256], index: 1, kind: input, shape index: {}]   ;;  %s2316_s2 = inlined_call_operand.vmem [shape: f32[4,32,128], index: 2, kind: input, shape index: {}]   ;;  %s2317_s3 = inlined_call_operand.vmem [shape: f32[8,128], index: 3, kind: input, shape index: {}]   ;;  %s2318_s4 = inlined_call_operand.hbm [shape: f32[16,32,256], index: 4, kind: input, shape index: {}, may-alias: {4,8}]   ;;  %s2319_s5 = inlined_call_operand.hbm [shape: f32[16,1,128], index: 5, kind: input, shape index: {}, may-alias: {5,9}]   ;;  %s2320_s6 = inlined_call_operand.hbm [shape: f32[16,1,128], index: 6, kind: input, shape index: {}, may-alias: {6,10}]   ;;  %s2321_s7 = inlined_call_operand.hbm [shape: f32[2,1,128], index: 7, kind: output, shape index: {0}]   ;;  %s2322_s8 = inlined_call_operand.hbm [shape: f32[16,32,256], index: 8, kind: output, shape index: {1}, may-alias: {4,8}]   ;;  %s2323_s9 = inlined_call_operand.hbm [shape: f32[16,1,128], index: 9, kind: output, shape index: {2}, may-alias: {5,9}]   ;;  %s2324_s10 = inlined_call_operand.hbm [shape: f32[16,1,128], index: 10, kind: output, shape index: {3}, may-alias: {6,10}]  }
   0x1   :  { %2365 = sst [smem:[#allocation59_spill]] %s2315_s1  ;;  %s17_s15 = sshll.u32 %s2314_s0, 4  ;;  %s18_s15 = int_to_ptr.vmem [resolvable:$true] %s17_s15 }
   0x2   :  { %2366 = sst [smem:[#allocation60_spill]] %s2316_s2 }
   0x3   :  { %2367 = sst [smem:[#allocation61_spill]] %s2317_s3 }
   0x4   :  { %2368 = sst [smem:[#allocation62_spill]] %s2318_s4 }
   0x5   :  { %2369 = sst [smem:[#allocation63_spill]] %s2319_s5 }
   0x6   :  { %2370 = sst [smem:[#allocation64_spill]] %s2320_s6 }
   0x7   :  { %2371 = sst [smem:[#allocation65_spill]] %s2321_s7 }
   0x8   :  { %2372 = sst [smem:[#allocation66_spill]] %s2322_s8 }
   0x9   :  { %2373 = sst [smem:[#allocation67_spill]] %s2323_s9 }
   0xa   :  { %2374 = sst [smem:[#allocation68_spill]] %s2324_s10 }
   0xb   :  { %20 = dma.vmem_to_smem %s18_s15, 16, %s1592_s16, [#allocation2] }
   0xc   :  { %1474 = dma.done.wait [#allocation2], 16 }
   0xd   :  { %1475 = vsyncadd [#allocation2], 4294967280 }
   0xe   :  { %23 = sfence }
   0xf   :  { %24 = vsyncpa [#allocation5], 0 }
  0x10   :  { %26 = vsyncpa [#allocation5 + $0x1], 0 }
  0x11   :  { %27 = vsyncpa [#allocation8], 0 }
  0x12   :  { %29 = vsyncpa [#allocation8 + $0x1], 0 }
  0x13   :  { %30 = vsyncpa [#allocation6], 0 }
  0x14   :  { %32 = vsyncpa [#allocation6 + $0x1], 0 }
  0x15   :  { %33 = vsyncpa [#allocation12], 0 }
  0x16   :  { %35 = vsyncpa [#allocation12 + $0x1], 0 }
  0x17   :  { %36 = vsyncpa [#allocation15], 0 }
  0x18   :  { %38 = vsyncpa [#allocation15 + $0x1], 0  ;;  %s1657_s17 = smov 0   ;;  %s1659_s18 = smov 0  }
  0x19   :  { %s1661_s0 = smov 0   ;;  %s1663_s19 = smov 0  }
  0x1a   :  { %s1665_s20 = smov 0   ;;  %s1667_s21 = smov 0  }
  0x1b   :  { %s1669_s22 = smov 0   ;;  %s1671_s23 = smov 0  }
  0x1c   :  { %s1673_s24 = smov 0   ;;  %s1675_s25 = smov 0  }
  0x1d   :  { %s1677_s26 = smov 0   ;;  %s1679_s27 = smov 0  }
  0x1e   :  { %s1681_s28 = smov 0   ;;  %s1683_s29 = smov 0  }
  0x1f   :  { %s1685_s30 = smov 0   ;;  %s1687_s11 = smov 0  }
  0x20   :  { %s1689_s12 = smov 0   ;;  %s1691_s13 = smov 0  }
  0x21   :  { %s1693_s14 = smov 0   ;;  %s1695_s15 = smov 0  }
  0x22   :  { %s1697_s16 = smov 0   ;;  %s1699_s10 = smov 0  }
  0x23 LB: > { %2375 = sst [smem:[#allocation33_spill]] %s1506_s17  ;;  %s1766_s9 = sadd.s32 4294967295, %s1590_s10   ;;  %s1590_s10 = sphi %s1699_s10, %s2501_s10   ;;  %s1586_s16 = sphi %s1697_s16, %s2494_s16   ;;  %s1582_s15 = sphi %s1695_s15, %s2500_s15   ;;  %s1578_s14 = sphi %s1693_s14, %s2499_s14   ;;  %s1574_s13 = sphi %s1691_s13, %s2492_s13   ;;  %s1570_s12 = sphi %s1689_s12, %s2491_s12   ;;  %s1566_s11 = sphi %s1687_s11, %s2490_s11   ;;  %s1562_s30 = sphi %s1685_s30, %s2489_s30   ;;  %s1558_s29 = sphi %s1683_s29, %s2498_s29   ;;  %s1554_s28 = sphi %s1681_s28, %s2497_s28   ;;  %s1550_s27 = sphi %s1679_s27, %s2487_s27   ;;  %s1546_s26 = sphi %s1677_s26, %s2486_s26   ;;  %s1542_s25 = sphi %s1675_s25, %s2496_s25   ;;  %s1538_s24 = sphi %s1673_s24, %s2484_s24   ;;  %s1534_s23 = sphi %s1671_s23, %s2483_s23   ;;  %s1530_s22 = sphi %s1669_s22, %s2495_s22   ;;  %s1526_s21 = sphi %s1667_s21, %s2481_s21   ;;  %s1522_s20 = sphi %s1665_s20, %s2480_s20   ;;  %s1518_s19 = sphi %s1663_s19, %s2479_s19   ;;  %s1514_s0 = sphi %s1661_s0, %s2478_s0   ;;  %s1510_s18 = sphi %s1659_s18, %s2477_s18   ;;  %s1506_s17 = sphi %s1657_s17, %s2476_s17  }
  0x24   : > { %2376 = sst [smem:[#allocation34_spill]] %s1510_s18  ;;  %s1770_s8 = sadd.s32 1, %s1590_s10  }
  0x25   : > { %2377 = sst [smem:[#allocation35_spill]] %s1514_s0  ;;  %p2341_p0 = scmp.eq.s32.totalorder %s1590_s10, 0 }
  0x26   : > { %2378 = sst [smem:[#allocation36_spill]] %s1522_s20  ;;  %p2346_p1 = scmp.eq.s32.totalorder %s1766_s9, 0 }
  0x27   : > { %2379 = sst [smem:[#allocation37_spill]] %s1526_s21  ;;  %s149_s1 = sadd.s32 1, %s1574_s13 }
  0x28   : > { %2380 = sst [smem:[#allocation38_spill]] %s1534_s23  ;;  %p156_p2 = scmp.ne.s32.totalorder %s1574_s13, %s1570_s12 }
  0x29   : > { %2381 = sst [smem:[#allocation39_spill]] %s1538_s24  ;;  %p162_p3 = scmp.ne.s32.totalorder %s1570_s12, %s1566_s11 }
  0x2a   : > { %2382 = sst [smem:[#allocation40_spill]] %s1542_s25  ;;  %s200_s6 = ssub.s32 %s1590_s10, %s1770_s8 }
  0x2b   : > { %2383 = sst [smem:[#allocation41_spill]] %s1546_s26  ;;  %s203_s7 = sadd.s32 1, %s1550_s27 }
  0x2c   : > { %2384 = sst [smem:[#allocation42_spill]] %s1550_s27  ;;  %p1785_p4 = por %p156_p2, %p2341_p0 }
  0x2d   : > { %2385 = sst [smem:[#allocation43_spill]] %s1554_s28  ;;  %p1791_p5 = por %p162_p3, %p2346_p1 }
  0x2e   : > { %2386 = sst [smem:[#allocation44_spill]] %s1562_s30  ;;  %p201_p6 = scmp.eq.s32.totalorder %s200_s6, 0 }
  0x2f   : > { %2387 = sst [smem:[#allocation45_spill]] %s1570_s12  ;;  %p213_p7 = scmp.ne.s32.totalorder %s1550_s27, %s1546_s26 }
  0x30   : > { %2388 = sst [smem:[#allocation46_spill]] %s1574_s13  ;;  %p2347_p8 = scmp.eq.s32.totalorder %s1766_s9, 1 }
  0x31   : > { %2389 = sst [smem:[#allocation47_spill]] %s1586_s16  ;;  %p219_p9 = scmp.ne.s32.totalorder %s1546_s26, %s1542_s25 }
  0x32   : > { %s144_s3 = sld [smem:[#allocation3 + %s1590_s10]]  ;;  %s2392_s12 = sadd.s32 4294967294, %s1590_s10  }
  0x33   : > { %s145_s2 = sld [smem:[#allocation3 + %s1770_s8]]  ;;  %p1802_p10 = scmp.eq.s32.totalorder %s2392_s12, 1 }
  0x34   : > { %p1808_p12 = por %p2347_p8, %p213_p7  ;;  %s226_s25 = sld [smem:[#allocation3 + %s1590_s10]] }
  0x35   : > { %p1820_p13 = por %p1802_p10, %p219_p9  ;;  %s231_s26 = sadd.s32 1, %s1538_s24 }
  0x36   : > { %s2394_s6 = scalar_select %p1808_p12, 1, 0 }
  0x37   : > { %s2398_s12 = scalar_select %p1820_p13, 1, 0 }
  0x38   : > { %2395 = sst [smem:[#allocation48_spill]] %s2394_s6  ;;  %p241_p2 = scmp.ne.s32.totalorder %s1538_s24, %s1534_s23 }
  0x39   : > { %s146_s11 = ssub.s32 %s144_s3, %s145_s2  ;;  %2399 = sst [smem:[#allocation51_spill]] %s2398_s12 }
  0x3a   : > { %p147_p11 = scmp.eq.s32.totalorder %s146_s11, 0  ;;  %s227_s11 = sld [smem:[#allocation3 + %s1770_s8]] }
  0x3b   : > { %s1813_s2 = scalar_select %p201_p6, %s1550_s27, %s203_s7  }
  0x3c   : > { %s1816_s3 = scalar_select %p147_p11, %s1574_s13, %s149_s1  }
  0x3d   : > { %2396 = sst [smem:[#allocation49_spill]] %s1813_s2  ;;  %p247_p3 = scmp.ne.s32.totalorder %s1534_s23, %s1530_s22 }
  0x3e   : > { %2397 = sst [smem:[#allocation50_spill]] %s1816_s3  ;;  %s259_s1 = sadd.s32 1, %s1526_s21 }
  0x3f   : > { %s254_s6 = sld [smem:[#allocation3 + %s1590_s10]]  ;;  %p1835_p6 = por %p241_p2, %p2347_p8 }
  0x40   : > { %p1841_p7 = por %p247_p3, %p1802_p10  ;;  %s255_s2 = sld [smem:[#allocation3 + %s1770_s8]] }
  0x41   : > { %s2400_s7 = scalar_select %p1835_p6, 1, 0 }
  0x42   : > { %s2401_s3 = scalar_select %p1841_p7, 1, 0 }
  0x43   : > { %p269_p9 = scmp.ne.s32.totalorder %s1526_s21, %s1522_s20  ;;  %p275_p11 = scmp.ne.s32.totalorder %s1522_s20, %s1518_s19 }
  0x44   : > { %2402 = sst [smem:[#allocation52_spill]] %s2401_s3  ;;  %s228_s27 = ssub.s32 %s226_s25, %s227_s11 }
  0x45   : > { %s282_s22 = sld [smem:[#allocation3 + %s1590_s10]]  ;;  %p1853_p2 = por %p269_p9, %p2347_p8 }
  0x46   : > { %p229_p0 = scmp.eq.s32.totalorder %s228_s27, 0  ;;  %p1859_p3 = por %p275_p11, %p1802_p10 }
  0x47   : > { %s2403_s12 = scalar_select %p1853_p2, 1, 0 }
  0x48   : > { %s2404_s3 = scalar_select %p1859_p3, 1, 0 }
  0x49   : > { %s283_s23 = sld [smem:[#allocation3 + %s1770_s8]]  ;;  %s287_s19 = sadd.s32 1, %s1514_s0 }
  0x4a   : > { %2405 = sst [smem:[#allocation53_spill]] %s2404_s3  ;;  %s256_s25 = ssub.s32 %s254_s6, %s255_s2 }
  0x4b   : > { %s1866_s20 = scalar_select %p229_p0, %s1538_s24, %s231_s26  }
  0x4c   : > { %p297_p9 = scmp.ne.s32.totalorder %s1514_s0, %s1510_s18  ;;  %p257_p1 = scmp.eq.s32.totalorder %s256_s25, 0 }
  0x4d   : > { %2406 = sst [smem:[#allocation54_spill]] %s1866_s20  ;;  %p303_p8 = scmp.ne.s32.totalorder %s1510_s18, %s1506_s17 }
  0x4e   : > { %p2407_p7 = scmp.eq.s32.totalorder %s1766_s9, 1  ;;  %p2355_p12 = scmp.lt.s32.totalorder %s1590_s10, 2 }
  0x4f   : > { %s1880_s11 = scalar_select %p257_p1, %s1526_s21, %s259_s1  }
  0x50   : > { %p1874_p11 = por %p297_p9, %p2407_p7  ;;  %s284_s26 = ssub.s32 %s282_s22, %s283_s23 }
  0x51   : > { %2409 = sst [smem:[#allocation55_spill]] %s1880_s11  ;;  %p1884_p0 = por %p303_p8, %p1802_p10 }
  0x52   : > { %s2408_s27 = scalar_select %p1874_p11, 1, 0 }
  0x53   : > { %s2410_s6 = scalar_select %p1884_p0, 1, 0 }
  0x54   : > { %p285_p13 = scmp.eq.s32.totalorder %s284_s26, 0  ;;  %s361_s2 = sand.u32 1, %s1590_s10  }
  0x55   : > { %2411 = sst [smem:[#allocation56_spill]] %s2410_s6  ;;  %s363_s25 = sand.u32 1, %s1574_s13  }
  0x56   : > { %s1892_s20 = scalar_select %p285_p13, %s1514_s0, %s287_s19  }
  0x57   : > { %s929_s24 = scalar_select %p1785_p4, [#allocation3], [#allocation17] }
  0x58   : > { %2412 = sst [smem:[#allocation57_spill]] %s1892_s20  ;;  %s364_s23 = scalar_lea.vmem [#allocation7], %s363_s25 }
  0x59   : > { %s930_s1 = scalar_select %p1785_p4, %s1590_s10, 0 }
  0x5a   : > { %s2503_s24 = smov (!%p2355_p12, %s929_s24), [#allocation23]  ;;  %s372_s30 = sshll.u32 %s364_s23, 4  ;;  %s373_s30 = int_to_ptr.vmem [resolvable:$true] %s372_s30 }
  0x5b   : > { %s2505_s1 = smov (!%p2355_p12, %s930_s1), 0  ;;  %p1907_p1 = pnand %p2355_p12, %p1785_p4 }
  0x5c   : > { %s365_s19 = sld [smem:[%s2503_s24 + %s2505_s1]]  ;;  %p906_p8 = scmp.ge.s32.totalorder %s1590_s10, 1 }
  0x5d   : > { %p395_p10 = scmp.lt.s32.totalorder %s1590_s10, 3  ;;  %s2415_s5 = sld [smem:[#allocation63_spill]] }
  0x5e   : > { %s116_s23 = sld [smem:[#allocation3 + %s1590_s10]]  ;;  %s1922_s20 = scalar_lea.sflag [#allocation8], %s361_s2 }
  0x5f   : > { %p1913_p13 = pnand %p906_p8, %p395_p10  ;;  %s117_s21 = sld [smem:[#allocation3 + %s1770_s8]] }
  0x60   : > { %p1188_p7 = pneg %p1907_p1 }
  0x63   : > { %s368_s25 = scalar_lea.hbm %s2415_s5, %s365_s19  ;;  %s1191_s17 = scalar_lea.hbm %s2415_s5, 16 }
  0x64   : > { %s370_s4 = sshll.u32 %s368_s25, 4  ;;  %s371_s4 = int_to_ptr.hbm [resolvable:$true] %s370_s4 }
  0x65   : > { %s1184_s0 = sshra.s32 %s371_s4, 4  ;;  %s1185_s0 = int_to_ptr.hbm [resolvable:$true] %s1184_s0 }
  0x66   : > { %s1186_s24 = scalar_lea.hbm %s1185_s0, 1  ;;  %p1192_p10 = scmp.lt.s32.totalorder %s1185_s0, %s2415_s5 }
  0x67   : > { %p1187_p4 = scmp.ne.s32.totalorder %s1185_s0, %s1186_s24  ;;  %p1193_p3 = scmp.lt.s32.totalorder %s1191_s17, %s1186_s24 }
  0x69   : > { %p1189_p9 = pnand %p1188_p7, %p1187_p4  ;;  %p1194_p12 = por %p1193_p3, %p1192_p10 }
  0x6b   : > { %p1190_p8 = pneg %p1189_p9 }
  0x6d   : > { %p1195_p0 = pnand %p1194_p12, %p1190_p8 }
  0x6f   : > { %1198 = shalt.err (!%p1195_p0)
}
  0x70   : > { %962 = dma.hbm_to_vmem [thread:$0]  (!%p1907_p1), %s371_s4, 16, %s373_s30, %s1922_s20  }
  0x71   : > { %p128_p3 = scmp.ne.s32.totalorder %s1586_s16, %s1582_s15  ;;  %p134_p12 = scmp.ne.s32.totalorder %s1582_s15, %s1578_s14 }
  0x72   : > { %s121_s17 = sadd.s32 1, %s1586_s16  ;;  %s338_s0 = sand.u32 1, %s1586_s16  }
  0x73   : > { %p2416_p0 = scmp.eq.s32.totalorder %s1766_s9, 0  ;;  %s118_s2 = ssub.s32 %s116_s23, %s117_s21 }
  0x74   : > { %p2418_p7 = scmp.eq.s32.totalorder %s1590_s10, 0  ;;  %s2419_s22 = sld [smem:[#allocation44_spill]] }
  0x75   : > { %p1943_p4 = por %p2416_p0, %p134_p12  ;;  %p119_p8 = scmp.eq.s32.totalorder %s118_s2, 0 }
  0x76   : > { %p130_p9 = por %p2418_p7, %p128_p3  ;;  %s903_s19 = sshll.u32 %s338_s0, 6 }
  0x77   : > { %p2420_p10 = scmp.lt.s32.totalorder %s1590_s10, 2  ;;  %s2421_s30 = sld [smem:[#allocation43_spill]] }
  0x78   : > { %s1956_s25 = scalar_select %p119_p8, %s1586_s16, %s121_s17  }
  0x79   : > { %p1951_p1 = pnand %p2420_p10, %p130_p9  ;;  %p2424_p12 = pmov %p2420_p10 }
  0x7a   : > { %2423 = sst [smem:[#allocation58_spill]] %s1956_s25  ;;  %p2425_p3 = pmov %p2420_p10 }
  0x7b   : > { %s926_s4 = scalar_select %p130_p9, [#allocation3], [#allocation16] }
  0x7c   : > { %s927_s24 = scalar_select %p130_p9, %s1590_s10, 0 }
  0x7d   : > { %s2507_s4 = smov (!%p2424_p12, %s926_s4), [#allocation22]  ;;  %s342_s21 = scalar_lea.vmem [#allocation4], %s903_s19 }
  0x7e   : > { %s2509_s24 = smov (!%p2425_p3, %s927_s24), 0  ;;  %s1963_s23 = sshll.u32 %s342_s21, 4  ;;  %s352_s23 = int_to_ptr.vmem [resolvable:$true] %s1963_s23 }
  0x7f   : > { %s343_s1 = sld [smem:[%s2507_s4 + %s2509_s24]]  ;;  %p184_p0 = scmp.ne.s32.totalorder %s2419_s22, %s1558_s29 }
  0x80   : > { %s1967_s13 = sld [smem:[#allocation3 + %s1590_s10]]  ;;  %p190_p7 = scmp.ne.s32.totalorder %s1558_s29, %s2421_s30 }
  0x81   : > { %s1970_s11 = sld [smem:[#allocation3 + %s1770_s8]]  ;;  %p2428_p9 = scmp.eq.s32.totalorder %s1590_s10, 0 }
  0x82   : > { %s2426_s25 = sld [smem:[#allocation62_spill]]  ;;  %p2430_p10 = scmp.eq.s32.totalorder %s1766_s9, 0 }
  0x83   : > { %p1981_p8 = por %p184_p0, %p2428_p9  ;;  %s339_s24 = scalar_lea.sflag [#allocation5], %s338_s0 }
  0x84   : > { %p1987_p12 = por %p190_p7, %p2430_p10  ;;  %p1218_p11 = pneg %p1951_p1 }
  0x85   : > { %s923_s17 = sshll.u32 %s343_s1, 6 }
  0x88   : > { %s2427_s3 = smov %s2426_s25  ;;  %s348_s16 = scalar_lea.hbm %s2426_s25, %s923_s17 }
  0x89   : > { %s349_s18 = sshll.u32 %s348_s16, 4  ;;  %s1221_s30 = scalar_lea.hbm %s2427_s3, 1024  ;;  %s350_s18 = int_to_ptr.hbm [resolvable:$true] %s349_s18 }
  0x8a   : > { %s1214_s21 = sshra.s32 %s350_s18, 4  ;;  %s1215_s21 = int_to_ptr.hbm [resolvable:$true] %s1214_s21 }
  0x8b   : > { %s1216_s1 = scalar_lea.hbm %s1215_s21, 64  ;;  %p1222_p0 = scmp.lt.s32.totalorder %s1215_s21, %s2427_s3 }
  0x8c   : > { %p1217_p3 = scmp.ne.s32.totalorder %s1215_s21, %s1216_s1  ;;  %p1223_p7 = scmp.lt.s32.totalorder %s1221_s30, %s1216_s1 }
  0x8e   : > { %p1219_p2 = pnand %p1218_p11, %p1217_p3  ;;  %p1224_p9 = por %p1223_p7, %p1222_p0 }
  0x90   : > { %p1220_p6 = pneg %p1219_p2 }
  0x92   : > { %p1225_p10 = pnand %p1224_p9, %p1220_p6 }
  0x94   : > { %1228 = shalt.err (!%p1225_p10)
}
  0x95   : > { %s1593_s0 = smov 256   ;;  %s1594_s2 = smov 16  }
  0x96   : > { %957 = dma.hbm_to_vmem [thread:$0]  (!%p1951_p1), %s350_s18, 1024, %s352_s23, %s339_s24, %s1593_s0, %s1593_s0, %s1594_s2  }
  0x97   : > { %s174_s21 = ssub.s32 %s1967_s13, %s1970_s11  ;;  %s177_s1 = sadd.s32 1, %s2419_s22 }
  0x98   : > { %p175_p6 = scmp.eq.s32.totalorder %s174_s21, 0  ;;  %s381_s5 = sand.u32 1, %s2419_s22  }
  0x99   : > { %s932_s16 = scalar_select %p1981_p8, [#allocation3], [#allocation18] }
  0x9a   : > { %s2511_s22 = smov (!%p175_p6, %s2419_s22), %s177_s1  ;;  %p2432_p2 = scmp.lt.s32.totalorder %s1590_s10, 2 }
  0x9b   : > { %s933_s30 = scalar_select %p1981_p8, %s1590_s10, 0 }
  0x9c   : > { %s2513_s16 = smov (!%p2432_p2, %s932_s16), [#allocation24]  ;;  %p2433_p11 = pmov %p2432_p2 }
  0x9d   : > { %p2434_p3 = pmov %p2432_p2  ;;  %s382_s23 = scalar_lea.vmem [#allocation9], %s381_s5 }
  0x9e   : > { %s2515_s30 = smov (!%p2433_p11, %s933_s30), 0  ;;  %s390_s13 = sshll.u32 %s382_s23, 4  ;;  %s391_s13 = int_to_ptr.vmem [resolvable:$true] %s390_s13 }
  0x9f   : > { %p2023_p0 = pnand %p2434_p3, %p1981_p8  ;;  %s383_s18 = sld [smem:[%s2513_s16 + %s2515_s30]] }
  0xa0   : > { %s2436_s25 = sld [smem:[#allocation64_spill]] }
  0xa1   : > { %p1248_p8 = pneg %p2023_p0 }
  0xa6   : > { %s2437_s2 = smov %s2436_s25  ;;  %s386_s17 = scalar_lea.hbm %s2436_s25, %s383_s18 }
  0xa7   : > { %s388_s0 = sshll.u32 %s386_s17, 4  ;;  %s1251_s5 = scalar_lea.hbm %s2437_s2, 16  ;;  %s389_s0 = int_to_ptr.hbm [resolvable:$true] %s388_s0 }
  0xa8   : > { %s1244_s21 = sshra.s32 %s389_s0, 4  ;;  %s1245_s21 = int_to_ptr.hbm [resolvable:$true] %s1244_s21 }
  0xa9   : > { %s1246_s1 = scalar_lea.hbm %s1245_s21, 1  ;;  %p1252_p10 = scmp.lt.s32.totalorder %s1245_s21, %s2437_s2 }
  0xaa   : > { %p1247_p1 = scmp.ne.s32.totalorder %s1245_s21, %s1246_s1  ;;  %p1253_p6 = scmp.lt.s32.totalorder %s1251_s5, %s1246_s1 }
  0xac   : > { %p1249_p7 = pnand %p1248_p8, %p1247_p1  ;;  %p1254_p2 = por %p1253_p6, %p1252_p10 }
  0xae   : > { %p1250_p9 = pneg %p1249_p7 }
  0xb0   : > { %p1255_p11 = pnand %p1254_p2, %p1250_p9 }
  0xb2   : > { %1258 = shalt.err (!%p1255_p11)
}
  0xb3   : > { %967 = dma.hbm_to_vmem [thread:$0]  (!%p2023_p0), %s389_s0, 16, %s391_s13, %s1922_s20  }
  0xb4   : > { %399 = sbr.rel (%p1913_p13) target bundleno = 633 (0x279), region = 44  ;;  %s401_s18 = sand.u32 (!%p1913_p13), 1, %s1582_s15  }
  0xb5   : > { %s402_s3 = scalar_lea.sflag (!%p1913_p13), [#allocation5], %s401_s18 }
  0xb9   : > { %1477 = dma.done.wait (%p1943_p4), %s402_s3, 1024  }
  0xba   : > { %1479 = vsyncadd (%p1943_p4), %s402_s3, 4294966272  ;;  %s2363_s23 = sand.u32 1, %s1766_s9  }
  0xbb   : > { %s412_s14 = scalar_lea.sflag [#allocation8], %s2363_s23 }
  0xbc   : > { %1481 = dma.done.wait (%p1791_p5), %s412_s14, 16  }
  0xbd   : > { %1483 = vsyncadd (%p1791_p5), %s412_s14, 4294967280 }
  0xbe   : > { %1485 = dma.done.wait (%p1987_p12), %s412_s14, 16  }
  0xbf   : > { %1487 = vsyncadd (%p1987_p12), %s412_s14, 4294967280  ;;  %p484_p13 = scmp.lt.s32.totalorder %s1766_s9, 1  ;;  %s2438_s11 = sld [smem:[#allocation59_spill]]  ;;  %v1595_v14 = vmov 256.0   ;;  %v536_v22 = vlaneseq  ;;  %vm541_vm1 = vcmask 130112   ;;  %vm545_vm2 = vcmask 195712  }
  0xc0   : > { %s2439_s25 = sld [smem:[#allocation60_spill]]  ;;  %1166 = vrcp.f32 %v1595_v14  ;;  %vm549_vm3 = vcmask 261312   ;;  %vm551_vm4 = vcmask 261120   ;;  %p2444_p5 = scmp.ne.s32.totalorder %s2400_s7, 0  ;;  %v1596_v60 = vmov 0.0  }
  0xc1   : > { %s485_s20 = scalar_select %p484_p13, %s1766_s9, 1  ;;  %v537_v26 = vand.u32 127, %v536_v22 }
  0xc2   : > { %s2441_s30 = sld [smem:[#allocation41_spill]]  ;;  %p2446_p4 = scmp.ne.s32.totalorder %s2403_s12, 0 }
  0xc3   : > { %s924_s26 = sshll.u32 %s485_s20, 6  ;;  %v539_v28 = vadd.s32 4294967288, %v537_v26  ;;  %v543_v29 = vadd.s32 4294967280, %v537_v26  ;;  %v547_v32 = vadd.s32 4294967272, %v537_v26  ;;  %s2442_s20 = sld [smem:[#allocation61_spill]]  ;;  %vm593_vm7 = vcmp.lt.s32.totalorder %v537_v26, 6 }
  0xc4   : > { %s2445_s13 = sld [smem:[#allocation38_spill]]  ;;  %v915_v61 = vsel %vm593_vm7, 1.0, %v1596_v60 }
  0xc5   : > { %s488_s24 = scalar_lea.vmem %s2438_s11, %s924_s26  ;;  %s2443_s26 = sld [smem:[#allocation36_spill]] }
  0xc6   : > { %v2064_v0 = vld [vmem:[%s488_s24] sm:$0xff]  ;;  %v2066_v1 = vld [vmem:[%s488_s24 + $0x8] sm:$0xff]  ;;  %v2076_v6 = vld [vmem:[%s488_s24 + $0x10] sm:$0xff]  ;;  %s2440_s1 = smov %s2439_s25  ;;  %v1167_v17 = vpop.eup %1166 }
  0xc7   : > { %v2068_v2 = vld [vmem:[%s488_s24 + $0x20] sm:$0xff]  ;;  %v503_v3 = vadd.f32 %v2066_v1, %v2064_v0  ;;  %v2072_v4 = vld [vmem:[%s488_s24 + $0x28] sm:$0xff]  ;;  %v2078_v7 = vld [vmem:[%s488_s24 + $0x18] sm:$0xff]  ;;  %v516_v18 = vmul.f32 256.0, %v1167_v17  ;;  %vm520_vm0 = vweird.f32 %v1167_v17  ;;  %s939_s11 = scalar_select %p2444_p5, [#allocation3], [#allocation19] }
  0xc8   : > { %v509_v5 = vadd.f32 %v2072_v4, %v2068_v2  ;;  %v2080_v8 = vld [vmem:[%s488_s24 + $0x30] sm:$0xff]  ;;  %v2082_v9 = vld [vmem:[%s488_s24 + $0x38] sm:$0xff]  ;;  %v506_v10 = vadd.f32 %v2078_v7, %v2076_v6  ;;  %v911_v15 = vld [vmem:[%s2440_s1 + $0x68] sm:$0xff]  ;;  %s463_s18 = sand.u32 1, %s2441_s30  }
  0xc9   : > { %504 = vadd.xlane.f32.xlu0 %v503_v3  ;;  %v512_v11 = vadd.f32 %v2082_v9, %v2080_v8  ;;  %v913_v12 = vld [vmem:[%s2439_s25 + $0x78] sm:$0xff]  ;;  %v912_v13 = vld [vmem:[%s2440_s1 + $0x70] sm:$0xff]  ;;  %v910_v16 = vld [vmem:[%s2440_s1 + $0x60] sm:$0xff]  ;;  %v517_v19 = vsub.f32 1.0, %v516_v18  ;;  %s2106_s6 = scalar_lea.vmem [#allocation10], %s463_s18  ;;  %s630_s23 = scalar_lea.sflag [#allocation6], %s463_s18 }
  0xca   : > { %510 = vadd.xlane.f32.xlu1 %v509_v5  ;;  %566 = vmatpush.msra.mxu0 %v913_v12  ;;  %v531_v43 = vld [vmem:[%s2442_s20 + $0x3] sm:$0x1]  ;;  %s940_s24 = scalar_select %p2444_p5, %s1766_s9, 0 }
  0xcb   : > { %v518_v20 = vmul.f32 %v1167_v17, %v517_v19  ;;  %s942_s28 = scalar_select %p2446_p4, [#allocation3], [#allocation20] }
  0xcc   : > { %567 = vmatpush.msra.mxu0 %v912_v13  ;;  %s662_s25 = sld [smem:[%s939_s11 + %s940_s24]]  ;;  %s469_s0 = sand.u32 1, %s2445_s13  }
  0xcd   : > { %v519_v21 = vadd.f32 %v1167_v17, %v518_v20  ;;  %s943_s17 = scalar_select %p2446_p4, %s1766_s9, 0 }
  0xce   : > { %568 = vmatpush.msra.mxu0 %v911_v15  ;;  %s907_s21 = sshll.u32 %s469_s0, 6  ;;  %s2447_s20 = sld [smem:[#allocation66_spill]] }
  0xcf   : > { %v521_v25 = vsel %vm520_vm0, %v1167_v17, %v519_v21  ;;  %s2121_s19 = sld [smem:[%s942_s28 + %s943_s17]]  ;;  %s2123_s16 = scalar_lea.vmem [#allocation11], %s907_s21 }
  0xd0   : > { %569 = vmatpush.msra.mxu0 %v910_v16  ;;  %619 = vst [vmem:[%s2123_s16] sm:$0xff] %v2064_v0  ;;  %s668_s11 = sshll.u32 %s2123_s16, 4  ;;  %s2449_s17 = sld [smem:[#allocation65_spill]]  ;;  %s2133_s11 = int_to_ptr.vmem [resolvable:$true] %s668_s11 }
  0xd1   : > { %507 = vadd.xlane.f32.xlu0 %v506_v10  ;;  %620 = vst [vmem:[%s2123_s16 + $0x8] sm:$0xff] %v2066_v1  ;;  %s2451_s21 = sld [smem:[#allocation48_spill]]  ;;  %s2452_s3 = sand.u32 1, %s2443_s26  }
  0xd2   : > { %513 = vadd.xlane.f32.xlu1 %v512_v11  ;;  %s925_s5 = sshll.u32 %s662_s25, 6  ;;  %621 = vst [vmem:[%s2123_s16 + $0x10] sm:$0xff] %v2076_v6  ;;  %s2149_s14 = scalar_lea.vmem [#allocation13], %s2452_s3 }
  0xd3   : > { %622 = vst [vmem:[%s2123_s16 + $0x18] sm:$0xff] %v2078_v7 }
  0xd4   : > { %s2448_s4 = smov %s2447_s20  ;;  %s667_s13 = scalar_lea.hbm %s2447_s20, %s925_s5  ;;  %623 = vst [vmem:[%s2123_s16 + $0x20] sm:$0xff] %v2068_v2 }
  0xd5   : > { %s670_s24 = sshll.u32 %s667_s13, 4  ;;  %s653_s20 = sshll.u32 %s2106_s6, 4  ;;  %624 = vst [vmem:[%s2123_s16 + $0x28] sm:$0xff] %v2072_v4  ;;  %s2139_s24 = int_to_ptr.hbm [resolvable:$true] %s670_s24  ;;  %s654_s20 = int_to_ptr.vmem [resolvable:$true] %s653_s20 }
  0xd6   : > { %s2450_s5 = smov %s2449_s17  ;;  %s651_s0 = scalar_lea.hbm %s2449_s17, %s1766_s9  ;;  %625 = vst [vmem:[%s2123_s16 + $0x30] sm:$0xff] %v2080_v8 }
  0xd7   : > { %s655_s13 = sshll.u32 %s651_s0, 4  ;;  %p2453_p3 = scmp.ne.s32.totalorder %s2451_s21, 0  ;;  %s656_s13 = int_to_ptr.hbm [resolvable:$true] %s655_s13 }
  0xd8   : > { %s1288_s28 = sshra.s32 %s656_s13, 4  ;;  %s1289_s28 = int_to_ptr.hbm [resolvable:$true] %s1288_s28 }
  0xd9   : > { %s1290_s25 = scalar_lea.hbm %s1289_s28, 1  ;;  %p1295_p8 = scmp.lt.s32.totalorder %s1289_s28, %s2450_s5 }
  0xda   : > { %p1291_p12 = scmp.ne.s32.totalorder %s1289_s28, %s1290_s25 }
  0xdc   : > { %p1292_p0 = pnand %p1291_p12, %p2453_p3 }
  0xde   : > { %p1293_p1 = pneg %p1292_p0 }
 0x13c   : > { %v505_v23 = vpop.xlane.xlu0 %504 }
 0x13d   : > { %v511_v24 = vpop.xlane.xlu1 %510  ;;  %v522_v27 = vmul.f32 %v521_v25, %v505_v23 }
 0x13e   : > { %v524_v30 = vmul.f32 %v521_v25, %v511_v24 }
 0x13f   : > { %v538_v36 = vperm.slane %v522_v27, %v537_v26 }
 0x140   : > { %v544_v38 = vperm.slane %v524_v30, %v543_v29 }
 0x144   : > { %v508_v31 = vpop.xlane.xlu0 %507 }
 0x145   : > { %v523_v33 = vmul.f32 %v521_v25, %v508_v31  ;;  %v514_v34 = vpop.xlane.xlu1 %513 }
 0x146   : > { %v525_v35 = vmul.f32 %v521_v25, %v514_v34 }
 0x147   : > { %v540_v37 = vperm.slane %v523_v33, %v539_v28 }
 0x148   : > { %v548_v39 = vperm.slane %v525_v35, %v547_v32 }
 0x149   : > { %v542_v40 = vsel %vm541_vm1, %v540_v37, %v538_v36 }
 0x14a   : > { %v546_v41 = vsel %vm545_vm2, %v544_v38, %v542_v40 }
 0x14b   : > { %v550_v42 = vsel %vm549_vm3, %v548_v39, %v546_v41 }
 0x14c   : > { %914 = vmatmul.msk.f32.vlgmr.msra.gmra.mxu0 %vm551_vm4, %v550_v42 }
 0x1c9   : > { %v571_v44 = vpop.f32.mrf.mxu0 }
 0x1ca   : > { %v572_v45 = vadd.f32 %v571_v44, %v531_v43 }
 0x1cc   : > { %v574_v46 = vsub.f32 0.0, %v572_v45  ;;  %610 = vst [vmem:[%s2106_s6] sm:$0x1] %v572_v45  ;;  %s1294_s6 = scalar_lea.hbm %s2450_s5, 2 }
 0x1cd   : > { %p1296_p7 = scmp.lt.s32.totalorder %s1294_s6, %s1290_s25 }
 0x1ce   : > { %v575_v47 = vmul.f32 1.442695, %v574_v46 }
 0x1cf   : > { %p1297_p9 = por %p1296_p7, %p1295_p8 }
 0x1d0   : > { %1168 = vpow2.f32 %v575_v47 }
 0x1d1   : > { %p1298_p10 = pnand %p1297_p9, %p1293_p1 }
 0x1d6   : > { %v1169_v48 = vpop.eup %1168 }
 0x1d7   : > { %v577_v49 = vadd.f32 1.0, %v1169_v48 }
 0x1d9   : > { %1170 = vrcp.f32 %v577_v49  ;;  %v589_v53 = vand.u32 2147483648, %v577_v49  ;;  %v587_v55 = vand.u32 2147483647, %v577_v49  ;;  %vm583_vm6 = vweird.f32 %v577_v49 }
 0x1db   : > { %v590_v57 = vor.u32 1.1754944e-38, %v589_v53  ;;  %vm588_vm9 = vcmp.eq.f32.partialorder %v587_v55, 8.507059e+37 }
 0x1df   : > { %v1171_v50 = vpop.eup %1170 }
 0x1e0   : > { %v579_v51 = vmul.f32 %v1171_v50, %v577_v49  ;;  %vm584_vm5 = vweird.f32 %v1171_v50 }
 0x1e1   : > { %vm585_vm8 = vmor %vm583_vm6, %vm584_vm5 }
 0x1e2   : > { %v580_v52 = vsub.f32 1.0, %v579_v51 }
 0x1e4   : > { %v581_v54 = vmul.f32 %v1171_v50, %v580_v52 }
 0x1e6   : > { %v582_v56 = vadd.f32 %v1171_v50, %v581_v54 }
 0x1e8   : > { %v586_v58 = vsel %vm585_vm8, %v1171_v50, %v582_v56 }
 0x1e9   : > { %v591_v59 = vsel %vm588_vm9, %v590_v57, %v586_v58 }
 0x1ea   : > { %v917_v62 = vadd.f32 -0.5, %v591_v59  ;;  %vm596_vm10 = vcmp.gt.f32.partialorder %v591_v59, 0.5 }
 0x1eb   : > { %v916_v63 = vsel %vm596_vm10, 1.0, %v1596_v60 }
 0x1ec   : > { %v601_v0 = vand.u32 2147483647, %v917_v62  ;;  %v599_v3 = vmul.f32 %v916_v63, %v915_v61 }
 0x1ee   : > { %v602_v1 = vmul.f32 2.0, %v601_v0  ;;  %627 = vst [vmem:[%s2149_s14] sm:$0x1] %v599_v3 }
 0x1f0   : > { %v603_v5 = vsub.f32 1.0, %v602_v1 }
 0x1f1   : > { %1301 = shalt.err (!%p1298_p10)
}
 0x1f2   : > { %938 = dma.vmem_to_hbm [thread:$0]  (%p2453_p3), %s654_s20, 16, %s656_s13, %s630_s23   ;;  %vm605_vm11 = vcmask 1040384   ;;  %626 = vst [vmem:[%s2123_s16 + $0x38] sm:$0xff] %v2082_v9  ;;  %v604_v2 = vmul.f32 %v915_v61, %v603_v5 }
 0x1f3   : > { %s2454_s26 = sld [smem:[#allocation67_spill]]  ;;  %s685_s25 = sshll.u32 %s2149_s14, 4  ;;  %s686_s25 = int_to_ptr.vmem [resolvable:$true] %s685_s25 }
 0x1f4   : > { %s2456_s17 = sand.u32 1, %s1766_s9   ;;  %s1316_s21 = sshra.s32 %s2139_s24, 4  ;;  %s1317_s21 = int_to_ptr.hbm [resolvable:$true] %s1316_s21 }
 0x1f5   : > { %s2178_s6 = scalar_lea.sflag [#allocation12], %s2456_s17  ;;  %s1318_s0 = scalar_lea.hbm %s1317_s21, 64 }
 0x1f6   : > { %p1319_p6 = scmp.ne.s32.totalorder %s1317_s21, %s1318_s0  ;;  %s1322_s16 = scalar_lea.hbm %s2448_s4, 1024 }
 0x1f7   : > { %p1323_p13 = scmp.lt.s32.totalorder %s1317_s21, %s2448_s4  ;;  %p1324_p12 = scmp.lt.s32.totalorder %s1322_s16, %s1318_s0 }
 0x1f8   : > { %p1320_p2 = pnand %p1319_p6, %p2444_p5 }
 0x1f9   : > { %s2455_s3 = smov %s2454_s26  ;;  %s683_s28 = scalar_lea.hbm %s2454_s26, %s2121_s19 }
 0x1fa   : > { %p1321_p11 = pneg %p1320_p2  ;;  %p1325_p3 = por %p1324_p12, %p1323_p13 }
 0x1fc   : > { %p1326_p0 = pnand %p1325_p3, %p1321_p11 }
 0x1fe   : > { %1329 = shalt.err (!%p1326_p0)
}
 0x1ff   : > { %s1597_s19 = smov 256   ;;  %s1598_s14 = smov 16   ;;  %v606_v4 = vsel %vm605_vm11, %v604_v2, 0.0 }
 0x200   : > { %941 = dma.vmem_to_hbm [thread:$0]  (%p2444_p5), %s2133_s11, 1024, %s2139_s24, %s2178_s6, %s1597_s19, %s1597_s19, %s1598_s14   ;;  %607 = vadd.xlane.f32.xlu2 %v606_v4 }
 0x201   : > { %s687_s30 = sshll.u32 %s683_s28, 4  ;;  %s1350_s21 = scalar_lea.hbm %s2455_s3, 16  ;;  %s688_s30 = int_to_ptr.hbm [resolvable:$true] %s687_s30 }
 0x202   : > { %s1344_s1 = sshra.s32 %s688_s30, 4  ;;  %s1345_s1 = int_to_ptr.hbm [resolvable:$true] %s1344_s1 }
 0x203   : > { %s1346_s18 = scalar_lea.hbm %s1345_s1, 1  ;;  %p1351_p5 = scmp.lt.s32.totalorder %s1345_s1, %s2455_s3 }
 0x204   : > { %p1347_p1 = scmp.ne.s32.totalorder %s1345_s1, %s1346_s18  ;;  %p1352_p9 = scmp.lt.s32.totalorder %s1350_s21, %s1346_s18 }
 0x206   : > { %p1348_p8 = pnand %p1347_p1, %p2446_p4  ;;  %p1353_p10 = por %p1352_p9, %p1351_p5 }
 0x208   : > { %p1349_p7 = pneg %p1348_p8 }
 0x20a   : > { %p1354_p6 = pnand %p1353_p10, %p1349_p7 }
 0x20c   : > { %1357 = shalt.err (!%p1354_p6)
}
 0x20d   : > { %s2457_s11 = sld [smem:[#allocation34_spill]]  ;;  %p2458_p2 = scmp.ne.s32.totalorder %s2408_s27, 0 }
 0x20e   : > { %944 = dma.vmem_to_hbm [thread:$0]  (%p2446_p4), %s686_s25, 16, %s688_s30, %s2178_s6  }
 0x20f   : > { %s945_s24 = scalar_select %p2458_p2, [#allocation3], [#allocation21] }
 0x210   : > { %s2517_s9 = smov (!%p2458_p2, %s1766_s9), 0  ;;  %s2459_s13 = sld [smem:[#allocation68_spill]] }
 0x211   : > { %s694_s28 = sld [smem:[%s945_s24 + %s2517_s9]] }
 0x213   : > { %s482_s23 = sand.u32 1, %s2457_s11  }
 0x214   : > { %s483_s14 = scalar_lea.vmem [#allocation14], %s482_s23  ;;  %s643_s25 = scalar_lea.sflag [#allocation15], %s482_s23 }
 0x215   : > { %s699_s18 = sshll.u32 %s483_s14, 4  ;;  %s700_s18 = int_to_ptr.vmem [resolvable:$true] %s699_s18 }
 0x216   : > { %s2460_s1 = smov %s2459_s13 }
 0x217   : > { %s697_s19 = scalar_lea.hbm %s2459_s13, %s694_s28  ;;  %s1378_s17 = scalar_lea.hbm %s2460_s1, 16 }
 0x218   : > { %s701_s12 = sshll.u32 %s697_s19, 4  ;;  %s702_s12 = int_to_ptr.hbm [resolvable:$true] %s701_s12 }
 0x219   : > { %s1372_s6 = sshra.s32 %s702_s12, 4  ;;  %s1373_s6 = int_to_ptr.hbm [resolvable:$true] %s1372_s6 }
 0x21a   : > { %s1374_s30 = scalar_lea.hbm %s1373_s6, 1  ;;  %p1379_p12 = scmp.lt.s32.totalorder %s1373_s6, %s2460_s1 }
 0x21b   : > { %p1375_p4 = scmp.ne.s32.totalorder %s1373_s6, %s1374_s30  ;;  %p1380_p3 = scmp.lt.s32.totalorder %s1378_s17, %s1374_s30 }
 0x21d   : > { %p1376_p11 = pnand %p1375_p4, %p2458_p2  ;;  %p1381_p0 = por %p1380_p3, %p1379_p12 }
 0x21f   : > { %p1377_p13 = pneg %p1376_p11 }
 0x221   : > { %p1382_p1 = pnand %p1381_p0, %p1377_p13 }
 0x273   : > { %v608_v6 = vpop.xlane.xlu2 %607 }
 0x274   : > { %v609_v7 = vmul.f32 0.16666667, %v608_v6 }
 0x276   : > { %628 = vst [vmem:[%s483_s14] sm:$0x1] %v609_v7 }
 0x277   : > { %1385 = shalt.err (!%p1382_p1)
}
 0x278   : > { %947 = dma.vmem_to_hbm [thread:$0]  (%p2458_p2), %s700_s18, 16, %s702_s12, %s643_s25  }
 0x279 PF: > { %s2461_s7 = sld [smem:[#allocation40_spill]]  ;;  %p2464_p7 = scmp.ge.s32.totalorder %s1590_s10, 2 }
 0x27a   : > { %s2462_s11 = sld [smem:[#allocation51_spill]] }
 0x27f   : > { %s713_s24 = sand.u32 1, %s2461_s7  }
 0x280   : > { %p2463_p8 = scmp.ne.s32.totalorder %s2462_s11, 0  ;;  %s714_s28 = scalar_lea.sflag [#allocation6], %s713_s24 }
 0x282   : > { %p969_p5 = pnand %p2464_p7, %p2463_p8 }
 0x284   : > { %p970_p9 = pneg %p969_p5 }
 0x286   : > { %1489 = dma.done.wait (%p970_p9), %s714_s28, 16  }
 0x287   : > { %1491 = vsyncadd (%p970_p9), %s714_s28, 4294967280  ;;  %s2465_s23 = sadd.s32 4294967294, %s1590_s10   ;;  %s2466_s20 = sld [smem:[#allocation52_spill]] }
 0x288   : > { %s722_s16 = sand.u32 1, %s2465_s23   ;;  %p2468_p6 = pmov %p2464_p7 }
 0x289   : > { %s723_s27 = scalar_lea.sflag [#allocation12], %s722_s16 }
 0x28d   : > { %p2467_p10 = scmp.ne.s32.totalorder %s2466_s20, 0 }
 0x28f   : > { %p972_p2 = pnand %p2468_p6, %p2467_p10 }
 0x291   : > { %p973_p4 = pneg %p972_p2 }
 0x293   : > { %1493 = dma.done.wait (%p973_p4), %s723_s27, 1024  }
 0x294   : > { %1495 = vsyncadd (%p973_p4), %s723_s27, 4294966272  ;;  %s2469_s13 = sld [smem:[#allocation53_spill]]  ;;  %p2471_p13 = pmov %p2468_p6 }
 0x29a   : > { %p2470_p11 = scmp.ne.s32.totalorder %s2469_s13, 0 }
 0x29c   : > { %p975_p12 = pnand %p2471_p13, %p2470_p11 }
 0x29e   : > { %p976_p3 = pneg %p975_p12 }
 0x2a0   : > { %1497 = dma.done.wait (%p976_p3), %s723_s27, 16  }
 0x2a1   : > { %1499 = vsyncadd (%p976_p3), %s723_s27, 4294967280  ;;  %s2472_s19 = sld [smem:[#allocation33_spill]]  ;;  %p2475_p1 = pmov %p2468_p6 }
 0x2a2   : > { %s2473_s14 = sld [smem:[#allocation56_spill]] }
 0x2a7   : > { %s741_s18 = sand.u32 1, %s2472_s19  }
 0x2a8   : > { %p2474_p0 = scmp.ne.s32.totalorder %s2473_s14, 0  ;;  %s742_s12 = scalar_lea.sflag [#allocation15], %s741_s18 }
 0x2aa   : > { %p978_p8 = pnand %p2475_p1, %p2474_p0 }
 0x2ac   : > { %p979_p7 = pneg %p978_p8 }
 0x2ae   : > { %1501 = dma.done.wait (%p979_p7), %s742_s12, 16  }
 0x2af   : > { %1503 = vsyncadd (%p979_p7), %s742_s12, 4294967280  ;;  %s2476_s17 = sld [smem:[#allocation34_spill]]  ;;  %s2489_s30 = smov %s2511_s22 }
 0x2b0   : > { %s2477_s18 = sld [smem:[#allocation35_spill]]  ;;  %p41_p5 = scmp.ge.s32.totalorder %s1770_s8, 4  }
 0x2b1   : > { %s2478_s0 = sld [smem:[#allocation57_spill]]  ;;  %s2497_s28 = smov %s1558_s29 }
 0x2b2   : > { %s2479_s19 = sld [smem:[#allocation36_spill]]  ;;  %s2499_s14 = smov %s1582_s15 }
 0x2b3   : > { %s2480_s20 = sld [smem:[#allocation37_spill]] }
 0x2b4   : > { %s2481_s21 = sld [smem:[#allocation55_spill]] }
 0x2b5   : > { %s2482_s25 = sld [smem:[#allocation38_spill]] }
 0x2b6   : > { %s2483_s23 = sld [smem:[#allocation39_spill]] }
 0x2b7   : > { %s2484_s24 = sld [smem:[#allocation54_spill]] }
 0x2b8   : > { %s2485_s6 = sld [smem:[#allocation41_spill]] }
 0x2b9   : > { %s2486_s26 = sld [smem:[#allocation42_spill]] }
 0x2ba   : > { %s2487_s27 = sld [smem:[#allocation49_spill]] }
 0x2bb   : > { %s2488_s10 = sld [smem:[#allocation44_spill]]  ;;  %s2495_s22 = smov %s2482_s25 }
 0x2bc   : > { %s2490_s11 = sld [smem:[#allocation45_spill]] }
 0x2bd   : > { %s2491_s12 = sld [smem:[#allocation46_spill]] }
 0x2be   : > { %s2492_s13 = sld [smem:[#allocation50_spill]]  ;;  %s2496_s25 = smov %s2485_s6 }
 0x2bf   : > { %s2493_s9 = sld [smem:[#allocation47_spill]] }
 0x2c0   : > { %s2494_s16 = sld [smem:[#allocation58_spill]] }
 0x2c1   : > { %s2498_s29 = smov %s2488_s10  ;;  %s2501_s10 = smov %s1770_s8 }
 0x2c2   :  { %43 = sbr.rel (!%p41_p5) target bundleno = 35 (0x23), region = 166 }
 0x2c5   : > { %s2500_s15 = smov %s2493_s9 }
 0x2c7   :  { %747 = vsyncpa [#allocation5], 1 }
 0x2c8   :  { %749 = vsyncpa [#allocation5 + $0x1], 1 }
 0x2c9   :  { %750 = vsyncpa [#allocation8], 1 }
 0x2ca   :  { %752 = vsyncpa [#allocation8 + $0x1], 1 }
 0x2cb   :  { %753 = vsyncpa [#allocation6], 1 }
 0x2cc   :  { %755 = vsyncpa [#allocation6 + $0x1], 1 }
 0x2cd   :  { %756 = vsyncpa [#allocation12], 1 }
 0x2ce   :  { %758 = vsyncpa [#allocation12 + $0x1], 1 }
 0x2cf   :  { %759 = vsyncpa [#allocation15], 1 }
 0x2d0   :  { %761 = vsyncpa [#allocation15 + $0x1], 1 }

</bundles_post_ra>
